<compile_context>
chip_gen: v5e
topology: v5e:2x2
jax: 0.10.0
libtpu: 0.0.40
codegen_flags: <defaults>
</compile_context>

<pallas_src>
import functools

import jax
import jax.numpy as jnp
import numpy as np
from jax.experimental import pallas as pl
from jax.experimental.pallas import tpu as pltpu

try:  # prefer scipy's C implementation for the host-side assignment
    from scipy.optimize import linear_sum_assignment as _scipy_lsa
except Exception:  # pragma: no cover - scipy not installed
    _scipy_lsa = None


def _round_up(x, m):
    return ((x + m - 1) // m) * m


# --------------------------------------------------------------------------- #
# Pallas kernel: fused class cost + weighted L1 feature costs
# --------------------------------------------------------------------------- #
def _cost_kernel(scores_ref, pfeat_ref, gfeat_ref, out_ref, *,
                 alpha, gamma, cls_gain, feat_gains, use_fl):
    # scores_ref : (1, TQ, TN)   pred class logits tile (nc == ngt by spec)
    # pfeat_ref  : (1, TQ, F)    packed pred features [kpts(2) | codes(8)]
    # gfeat_ref  : (F, TN)       packed gt features, transposed (feat, ngt)
    # out_ref    : (1, TQ, TN)   cost matrix tile
    s = scores_ref[0].astype(jnp.float32)                       # (TQ, TN)

    if use_fl:
        p = jax.nn.sigmoid(s)
        one_m_p = 1.0 - p
        if gamma == 2.0:
            # specialize pow-with-float-exponent -> plain VPU squaring
            p_pow = p * p
            q_pow = one_m_p * one_m_p
        else:
            p_pow = p ** gamma
            q_pow = one_m_p ** gamma
        neg_cost_class = (1.0 - alpha) * p_pow * (-jnp.log(one_m_p + 1e-8))
        pos_cost_class = alpha * q_pow * (-jnp.log(p + 1e-8))
        cost_class = pos_cost_class - neg_cost_class
    else:
        # softmax over the full class row (TN == full padded class dim here)
        cost_class = -jax.nn.softmax(s, axis=-1)

    C = cls_gain * cost_class

    pf = pfeat_ref[0].astype(jnp.float32)                       # (TQ, F)
    gf = gfeat_ref[...].astype(jnp.float32)                     # (F, TN)
    # weighted L1 over the tiny packed feature dim, statically unrolled as
    # lane-friendly (TQ, 1) - (1, TN) broadcasts accumulated directly into C.
    for d, w in enumerate(feat_gains):
        C = C + w * jnp.abs(pf[:, d:d + 1] - gf[d:d + 1, :])

    out_ref[0] = C.astype(out_ref.dtype)


def compute_cost_matrix(pred_scores, pred_feats, gt_feats_t, *,
                        alpha, gamma, cls_gain, feat_gains, use_fl):
    bs, nq, nc = pred_scores.shape
    feat = pred_feats.shape[-1]
    ngt = gt_feats_t.shape[-1]
    assert gt_feats_t.shape[0] == feat == len(feat_gains)
    # The reference adds cost_class (bs*nq, nc) elementwise to cost_kpts
    # (bs*nq, ngt_total), which requires nc == total number of gt targets.
    assert nc == ngt, "pred_scores class dim must equal total number of gt targets"

    # ---- tile selection: lane-dense ngt (mult of 128), sublane-aligned nq ----
    if use_fl:
        tn = 1024 if ngt >= 1024 else _round_up(max(ngt, 1), 128)
    else:
        # softmax normalizes over the full class row -> no tiling along nc/ngt
        tn = _round_up(max(ngt, 1), 128)
    tq = 256 if nq >= 256 else _round_up(max(nq, 1), 8)
    # keep double-buffered (scores + out) blocks well inside scoped VMEM
    # (important on v7x: 64 MiB physical / 32 MiB scoped default).
    while tq > 8 and 16 * tq * tn > 24 * (1 << 20):
        tq //= 2
    tq = max(_round_up(tq, 8), 8)

    nq_pad = _round_up(nq, tq)
    n_pad = _round_up(ngt, tn)

    # ---- padding: scores padded with a large negative logit so padded class
    # columns are inert under both sigmoid-focal and softmax; features are
    # zero-padded.  Padded rows/columns are sliced off before the Hungarian. ----
    if nq_pad != nq or n_pad != nc:
        scores_p = jnp.pad(pred_scores, ((0, 0), (0, nq_pad - nq), (0, n_pad - nc)),
                           constant_values=-1e9)
    else:
        scores_p = pred_scores
    if nq_pad != nq:
        pfeat_p = jnp.pad(pred_feats, ((0, 0), (0, nq_pad - nq), (0, 0)))
    else:
        pfeat_p = pred_feats
    if n_pad != ngt:
        gfeat_p = jnp.pad(gt_feats_t, ((0, 0), (0, n_pad - ngt)))
    else:
        gfeat_p = gt_feats_t

    grid = (bs, nq_pad // tq, n_pad // tn)
    elems = bs * nq_pad * n_pad
    cost_est = pl.CostEstimate(
        flops=int(elems * (12 + 3 * feat)),
        transcendentals=int(elems * (3 if use_fl else 1)),
        bytes_accessed=int(scores_p.size * scores_p.dtype.itemsize
                           + pfeat_p.size * pfeat_p.dtype.itemsize
                           + gfeat_p.size * gfeat_p.dtype.itemsize
                           + elems * 4),
    )

    kernel = functools.partial(_cost_kernel, alpha=float(alpha), gamma=float(gamma),
                               cls_gain=float(cls_gain),
                               feat_gains=tuple(float(w) for w in feat_gains),
                               use_fl=use_fl)
    out = pl.pallas_call(
        kernel,
        out_shape=jax.ShapeDtypeStruct((bs, nq_pad, n_pad), jnp.float32),
        grid=grid,
        in_specs=[
            pl.BlockSpec((1, tq, tn), lambda b, q, n: (b, q, n)),
            pl.BlockSpec((1, tq, feat), lambda b, q, n: (b, q, 0)),
            pl.BlockSpec((feat, tn), lambda b, q, n: (0, n)),
        ],
        out_specs=pl.BlockSpec((1, tq, tn), lambda b, q, n: (b, q, n)),
        compiler_params=pltpu.CompilerParams(
            dimension_semantics=("parallel", "parallel", "parallel")),
        cost_estimate=cost_est,
    )(scores_p, pfeat_p, gfeat_p)
    return out[:, :nq, :ngt]


# --------------------------------------------------------------------------- #
# Host-side Hungarian algorithm.
# TODO(synk): no Pallas equivalent — sequential augmenting-path algorithm on host.
# --------------------------------------------------------------------------- #
def _lsa_numpy(cost):
    """Numpy-vectorized Jonker–Volgenant style assignment (scipy-compatible)."""
    cost = np.asarray(cost, dtype=np.float64)
    transposed = False
    if cost.shape[0] > cost.shape[1]:
        cost = cost.T
        transposed = True
    n, m = cost.shape  # n <= m
    if n == 0 or m == 0:
        e = np.zeros(0, dtype=np.int64)
        return e, e
    INF = 1e18
    u = np.zeros(n + 1)
    v = np.zeros(m + 1)
    p = np.zeros(m + 1, dtype=np.int64)
    way = np.zeros(m + 1, dtype=np.int64)
    cols = np.arange(1, m + 1)
    for i in range(1, n + 1):
        p[0] = i
        j0 = 0
        minv = np.full(m + 1, INF)
        used = np.zeros(m + 1, dtype=bool)
        while True:
            used[j0] = True
            i0 = p[j0]
            free = cols[~used[1:]]                                   # 1-based
            cur = cost[i0 - 1, free - 1] - u[i0] - v[free]
            better = cur < minv[free]
            upd = free[better]
            minv[upd] = cur[better]
            way[upd] = j0
            k = int(np.argmin(minv[free]))
            j1 = int(free[k])
            delta = minv[j1]
            u[p[used]] += delta
            v[used] -= delta
            minv[~used] -= delta
            j0 = j1
            if p[j0] == 0:
                break
        while True:
            j1 = way[j0]
            p[j0] = p[j1]
            j0 = j1
            if j0 == 0:
                break
    row_ind, col_ind = [], []
    for j in range(1, m + 1):
        if p[j] != 0:
            row_ind.append(p[j] - 1)
            col_ind.append(j - 1)
    row_ind = np.asarray(row_ind, dtype=np.int64)
    col_ind = np.asarray(col_ind, dtype=np.int64)
    if transposed:
        order = np.argsort(col_ind)
        return col_ind[order], row_ind[order]
    order = np.argsort(row_ind)
    return row_ind[order], col_ind[order]


def _linear_sum_assignment(cost):
    cost = np.asarray(cost, dtype=np.float64)
    if _scipy_lsa is not None:
        i, j = _scipy_lsa(cost)
        return np.asarray(i, dtype=np.int64), np.asarray(j, dtype=np.int64)
    return _lsa_numpy(cost)


# --------------------------------------------------------------------------- #
# HungarianMatcher forward
# --------------------------------------------------------------------------- #
def hungarian_matcher(pred_kpts, pred_scores, pred_codes, gt_kpts, gt_cls, gt_codes,
                      cost_gain=None, use_fl=True, alpha=0.25, gamma=2.0):
    if cost_gain is None:
        cost_gain = {'cls': 1, 'centroid': 3, 'code': 3}
    bs, nq, nc = pred_scores.shape

    pred_kpts = jnp.reshape(pred_kpts, (bs, nq, 2))
    pred_codes = jnp.reshape(pred_codes, (bs, nq, 8))
    gt_kpts_f = jnp.reshape(gt_kpts, (-1, 2))
    gt_codes_f = jnp.reshape(gt_codes, (-1, gt_codes.shape[-1]))
    _ = jnp.reshape(gt_cls, (-1,))  # gt_cls is not used by the reference cost
    assert gt_codes_f.shape[-1] == 8, "gt code dim must be 8 (matches pred codes)"

    ngt = gt_kpts_f.shape[0]
    assert nc == ngt, "pred_scores class dim must equal total number of gt targets"

    # pack features (keep original dtypes: cast to f32 happens inside the kernel)
    pred_feats = jnp.concatenate([pred_kpts, pred_codes], axis=-1)       # (bs, nq, 10)
    gt_feats_t = jnp.concatenate([gt_kpts_f, gt_codes_f], axis=-1).T     # (10, ngt)
    feat_gains = (float(cost_gain['centroid']),) * 2 + \
                 (float(cost_gain['code']) / 8.0,) * 8

    C = compute_cost_matrix(pred_scores, pred_feats, gt_feats_t,
                            alpha=alpha, gamma=gamma,
                            cls_gain=float(cost_gain['cls']),
                            feat_gains=feat_gains, use_fl=use_fl)
    C = np.asarray(jax.block_until_ready(C))  # (bs, nq, ngt)
    indices = [_linear_sum_assignment(c) for c in C]
    return [(np.asarray(i, dtype=np.int64), np.asarray(j, dtype=np.int64))
            for i, j in indices]


# --------------------------------------------------------------------------- #
# Pure-numpy reference of the cost matrix (for validation of the kernel).
# --------------------------------------------------------------------------- #
def _cost_reference(pred_kpts, pred_scores, pred_codes, gt_kpts, gt_codes,
                    alpha=0.25, gamma=2.0, gains=None, use_fl=True):
    gains = gains or {'cls': 1.0, 'centroid': 3.0, 'code': 3.0}
    bs, nq, nc = pred_scores.shape
    s = np.asarray(pred_scores, np.float64).reshape(-1, nc)
    if use_fl:
        ps = 1.0 / (1.0 + np.exp(-s))
        neg = (1 - alpha) * ps ** gamma * -np.log(1 - ps + 1e-8)
        pos = alpha * (1 - ps) ** gamma * -np.log(ps + 1e-8)
        cost_class = pos - neg
    else:
        e = np.exp(s - s.max(-1, keepdims=True))
        cost_class = -(e / e.sum(-1, keepdims=True))
    pk = np.asarray(pred_kpts, np.float64).reshape(-1, 2)
    gk = np.asarray(gt_kpts, np.float64).reshape(-1, 2)
    cost_kpts = np.abs(pk[:, None, :] - gk[None, :, :]).sum(-1)
    pc = np.asarray(pred_codes, np.float64).reshape(-1, 8)
    gc = np.asarray(gt_codes, np.float64).reshape(-1, gt_codes.shape[-1])
    cost_codes = np.abs(pc[:, None, :] - gc[None, :, :]).sum(-1) / pc.shape[-1]
    C = (gains['cls'] * cost_class + gains['centroid'] * cost_kpts
         + gains['code'] * cost_codes)
    return C.reshape(bs, nq, -1)


if __name__ == "__main__":
    key = jax.random.PRNGKey(0)
    bs, nq = 2, 8
    ngt_per_img = 4
    nc = bs * ngt_per_img  # == total gt, required by the reference's broadcasting

    k1, k2, k3, k4, k5, k6 = jax.random.split(key, 6)
    pred_kpts = jax.random.uniform(k1, (bs, nq, 2), dtype=jnp.float32)
    pred_scores = jax.random.normal(k2, (bs, nq, nc), dtype=jnp.float32)
    pred_codes = jax.random.normal(k3, (bs, nq, 8), dtype=jnp.float32)
    gt_kpts = jax.random.uniform(k4, (bs, ngt_per_img, 2), dtype=jnp.float32)
    gt_cls = jax.random.randint(k5, (bs, ngt_per_img), 0, 4)
    gt_codes = jax.random.normal(k6, (bs, ngt_per_img, 8), dtype=jnp.float32)

    gains = {'cls': 1.0, 'centroid': 3.0, 'code': 3.0}
    feat_gains = (gains['centroid'],) * 2 + (gains['code'] / 8.0,) * 8
    pred_feats = jnp.concatenate([pred_kpts, pred_codes], axis=-1)
    gt_feats_t = jnp.concatenate([jnp.reshape(gt_kpts, (-1, 2)),
                                  jnp.reshape(gt_codes, (-1, 8))], axis=-1).T

    # Validate the Pallas cost matrix (focal branch) against a numpy reference.
    C_pallas = compute_cost_matrix(pred_scores, pred_feats, gt_feats_t,
                                   alpha=0.25, gamma=2.0, cls_gain=gains['cls'],
                                   feat_gains=feat_gains, use_fl=True)
    C_pallas = np.asarray(jax.block_until_ready(C_pallas))
    C_ref = _cost_reference(pred_kpts, pred_scores, pred_codes, gt_kpts, gt_codes,
                            use_fl=True)
    assert np.allclose(C_pallas, C_ref, rtol=1e-4, atol=1e-4), "focal cost mismatch"

    # Validate the softmax (use_fl=False) branch too.
    C_pallas_sm = compute_cost_matrix(pred_scores, pred_feats, gt_feats_t,
                                      alpha=0.25, gamma=2.0, cls_gain=gains['cls'],
                                      feat_gains=feat_gains, use_fl=False)
    C_pallas_sm = np.asarray(jax.block_until_ready(C_pallas_sm))
    C_ref_sm = _cost_reference(pred_kpts, pred_scores, pred_codes, gt_kpts, gt_codes,
                               use_fl=False)
    assert np.allclose(C_pallas_sm, C_ref_sm, rtol=1e-4, atol=1e-4), \
        "softmax cost mismatch"

    # Full matcher forward (kernel + host Hungarian assignment).
    matches = hungarian_matcher(pred_kpts, pred_scores, pred_codes,
                                gt_kpts, gt_cls, gt_codes)
    n_match = min(nq, bs * ngt_per_img)
    for i, j in matches:
        assert len(i) == len(j) == n_match

    print("KERNEL_OK")
</pallas_src>

<mosaic_0001>
module attributes {stable_mosaic.version = 11 : i64} {
  func.func @_cost_kernel(%arg0: i32, %arg1: i32, %arg2: i32, %arg3: memref<1x8x128xf32, #tpu.memory_space<vmem>>, %arg4: memref<1x8x10xf32, #tpu.memory_space<vmem>>, %arg5: memref<10x128xf32, #tpu.memory_space<vmem>>, %arg6: memref<1x8x128xf32, #tpu.memory_space<vmem>>) attributes {dimension_semantics = [#tpu.dimension_semantics<parallel>, #tpu.dimension_semantics<parallel>, #tpu.dimension_semantics<parallel>], iteration_bounds = array<i64: 2, 1, 1>, scalar_prefetch = 0 : i64, scratch_operands = 0 : i64, tpu.core_type = #tpu.core_type<tc>, window_params = [{transform_indices = @transform_0, window_bounds = array<i64: 1, 8, 128>}, {transform_indices = @transform_1, window_bounds = array<i64: 1, 8, 10>}, {transform_indices = @transform_2, window_bounds = array<i64: 10, 128>}, {transform_indices = @transform_3, window_bounds = array<i64: 1, 8, 128>}]} {
    %c0 = arith.constant 0 : index
    %c0_0 = arith.constant 0 : index
    %c0_1 = arith.constant 0 : index
    %0 = vector.load %arg3[%c0, %c0_0, %c0_1] : memref<1x8x128xf32, #tpu.memory_space<vmem>>, vector<1x8x128xf32>
    %1 = vector.shape_cast %0 : vector<1x8x128xf32> to vector<8x128xf32>
    %2 = arith.negf %1 : vector<8x128xf32>
    %3 = math.exp %2 : vector<8x128xf32>
    %cst = arith.constant 1.000000e+00 : f32
    %4 = vector.broadcast %cst : f32 to vector<8x128xf32>
    %5 = arith.addf %4, %3 : vector<8x128xf32>
    %6 = arith.divf %4, %5 : vector<8x128xf32>
    %cst_2 = arith.constant 1.000000e+00 : f32
    %7 = vector.broadcast %cst_2 : f32 to vector<8x128xf32>
    %8 = arith.subf %7, %6 : vector<8x128xf32>
    %9 = arith.mulf %6, %6 : vector<8x128xf32>
    %10 = arith.mulf %8, %8 : vector<8x128xf32>
    %cst_3 = arith.constant 7.500000e-01 : f32
    %11 = vector.broadcast %cst_3 : f32 to vector<8x128xf32>
    %12 = arith.mulf %11, %9 : vector<8x128xf32>
    %cst_4 = arith.constant 9.99999993E-9 : f32
    %13 = vector.broadcast %cst_4 : f32 to vector<8x128xf32>
    %14 = arith.addf %8, %13 : vector<8x128xf32>
    %15 = math.log %14 : vector<8x128xf32>
    %cst_5 = arith.constant 0.000000e+00 : f32
    %16 = vector.broadcast %cst_5 : f32 to vector<8x128xf32>
    %17 = arith.subf %16, %15 : vector<8x128xf32>
    %18 = arith.mulf %12, %17 : vector<8x128xf32>
    %cst_6 = arith.constant 2.500000e-01 : f32
    %19 = vector.broadcast %cst_6 : f32 to vector<8x128xf32>
    %20 = arith.mulf %19, %10 : vector<8x128xf32>
    %cst_7 = arith.constant 9.99999993E-9 : f32
    %21 = vector.broadcast %cst_7 : f32 to vector<8x128xf32>
    %22 = arith.addf %6, %21 : vector<8x128xf32>
    %23 = math.log %22 : vector<8x128xf32>
    %cst_8 = arith.constant 0.000000e+00 : f32
    %24 = vector.broadcast %cst_8 : f32 to vector<8x128xf32>
    %25 = arith.subf %24, %23 : vector<8x128xf32>
    %26 = arith.mulf %20, %25 : vector<8x128xf32>
    %27 = arith.subf %26, %18 : vector<8x128xf32>
    %cst_9 = arith.constant 1.000000e+00 : f32
    %28 = vector.broadcast %cst_9 : f32 to vector<8x128xf32>
    %29 = arith.mulf %28, %27 : vector<8x128xf32>
    %c0_10 = arith.constant 0 : index
    %c0_11 = arith.constant 0 : index
    %c0_12 = arith.constant 0 : index
    %30 = vector.load %arg4[%c0_10, %c0_11, %c0_12] : memref<1x8x10xf32, #tpu.memory_space<vmem>>, vector<1x8x10xf32>
    %31 = vector.shape_cast %30 : vector<1x8x10xf32> to vector<8x10xf32>
    %c0_13 = arith.constant 0 : index
    %c0_14 = arith.constant 0 : index
    %32 = vector.load %arg5[%c0_13, %c0_14] : memref<10x128xf32, #tpu.memory_space<vmem>>, vector<10x128xf32>
    %33 = vector.extract_strided_slice %31 {offsets = [0, 0], sizes = [8, 1], strides = [1, 1]} : vector<8x10xf32> to vector<8x1xf32>
    %34 = vector.extract_strided_slice %32 {offsets = [0, 0], sizes = [1, 128], strides = [1, 1]} : vector<10x128xf32> to vector<1x128xf32>
    %35 = vector.broadcast %33 : vector<8x1xf32> to vector<8x128xf32>
    %36 = vector.broadcast %34 : vector<1x128xf32> to vector<8x128xf32>
    %37 = arith.subf %35, %36 : vector<8x128xf32>
    %38 = math.absf %37 : vector<8x128xf32>
    %cst_15 = arith.constant 3.000000e+00 : f32
    %39 = vector.broadcast %cst_15 : f32 to vector<8x128xf32>
    %40 = arith.mulf %39, %38 : vector<8x128xf32>
    %41 = arith.addf %29, %40 : vector<8x128xf32>
    %42 = vector.extract_strided_slice %31 {offsets = [0, 1], sizes = [8, 1], strides = [1, 1]} : vector<8x10xf32> to vector<8x1xf32>
    %43 = vector.extract_strided_slice %32 {offsets = [1, 0], sizes = [1, 128], strides = [1, 1]} : vector<10x128xf32> to vector<1x128xf32>
    %44 = vector.broadcast %42 : vector<8x1xf32> to vector<8x128xf32>
    %45 = vector.broadcast %43 : vector<1x128xf32> to vector<8x128xf32>
    %46 = arith.subf %44, %45 : vector<8x128xf32>
    %47 = math.absf %46 : vector<8x128xf32>
    %cst_16 = arith.constant 3.000000e+00 : f32
    %48 = vector.broadcast %cst_16 : f32 to vector<8x128xf32>
    %49 = arith.mulf %48, %47 : vector<8x128xf32>
    %50 = arith.addf %41, %49 : vector<8x128xf32>
    %51 = vector.extract_strided_slice %31 {offsets = [0, 2], sizes = [8, 1], strides = [1, 1]} : vector<8x10xf32> to vector<8x1xf32>
    %52 = vector.extract_strided_slice %32 {offsets = [2, 0], sizes = [1, 128], strides = [1, 1]} : vector<10x128xf32> to vector<1x128xf32>
    %53 = vector.broadcast %51 : vector<8x1xf32> to vector<8x128xf32>
    %54 = vector.broadcast %52 : vector<1x128xf32> to vector<8x128xf32>
    %55 = arith.subf %53, %54 : vector<8x128xf32>
    %56 = math.absf %55 : vector<8x128xf32>
    %cst_17 = arith.constant 3.750000e-01 : f32
    %57 = vector.broadcast %cst_17 : f32 to vector<8x128xf32>
    %58 = arith.mulf %57, %56 : vector<8x128xf32>
    %59 = arith.addf %50, %58 : vector<8x128xf32>
    %60 = vector.extract_strided_slice %31 {offsets = [0, 3], sizes = [8, 1], strides = [1, 1]} : vector<8x10xf32> to vector<8x1xf32>
    %61 = vector.extract_strided_slice %32 {offsets = [3, 0], sizes = [1, 128], strides = [1, 1]} : vector<10x128xf32> to vector<1x128xf32>
    %62 = vector.broadcast %60 : vector<8x1xf32> to vector<8x128xf32>
    %63 = vector.broadcast %61 : vector<1x128xf32> to vector<8x128xf32>
    %64 = arith.subf %62, %63 : vector<8x128xf32>
    %65 = math.absf %64 : vector<8x128xf32>
    %cst_18 = arith.constant 3.750000e-01 : f32
    %66 = vector.broadcast %cst_18 : f32 to vector<8x128xf32>
    %67 = arith.mulf %66, %65 : vector<8x128xf32>
    %68 = arith.addf %59, %67 : vector<8x128xf32>
    %69 = vector.extract_strided_slice %31 {offsets = [0, 4], sizes = [8, 1], strides = [1, 1]} : vector<8x10xf32> to vector<8x1xf32>
    %70 = vector.extract_strided_slice %32 {offsets = [4, 0], sizes = [1, 128], strides = [1, 1]} : vector<10x128xf32> to vector<1x128xf32>
    %71 = vector.broadcast %69 : vector<8x1xf32> to vector<8x128xf32>
    %72 = vector.broadcast %70 : vector<1x128xf32> to vector<8x128xf32>
    %73 = arith.subf %71, %72 : vector<8x128xf32>
    %74 = math.absf %73 : vector<8x128xf32>
    %cst_19 = arith.constant 3.750000e-01 : f32
    %75 = vector.broadcast %cst_19 : f32 to vector<8x128xf32>
    %76 = arith.mulf %75, %74 : vector<8x128xf32>
    %77 = arith.addf %68, %76 : vector<8x128xf32>
    %78 = vector.extract_strided_slice %31 {offsets = [0, 5], sizes = [8, 1], strides = [1, 1]} : vector<8x10xf32> to vector<8x1xf32>
    %79 = vector.extract_strided_slice %32 {offsets = [5, 0], sizes = [1, 128], strides = [1, 1]} : vector<10x128xf32> to vector<1x128xf32>
    %80 = vector.broadcast %78 : vector<8x1xf32> to vector<8x128xf32>
    %81 = vector.broadcast %79 : vector<1x128xf32> to vector<8x128xf32>
    %82 = arith.subf %80, %81 : vector<8x128xf32>
    %83 = math.absf %82 : vector<8x128xf32>
    %cst_20 = arith.constant 3.750000e-01 : f32
    %84 = vector.broadcast %cst_20 : f32 to vector<8x128xf32>
    %85 = arith.mulf %84, %83 : vector<8x128xf32>
    %86 = arith.addf %77, %85 : vector<8x128xf32>
    %87 = vector.extract_strided_slice %31 {offsets = [0, 6], sizes = [8, 1], strides = [1, 1]} : vector<8x10xf32> to vector<8x1xf32>
    %88 = vector.extract_strided_slice %32 {offsets = [6, 0], sizes = [1, 128], strides = [1, 1]} : vector<10x128xf32> to vector<1x128xf32>
    %89 = vector.broadcast %87 : vector<8x1xf32> to vector<8x128xf32>
    %90 = vector.broadcast %88 : vector<1x128xf32> to vector<8x128xf32>
    %91 = arith.subf %89, %90 : vector<8x128xf32>
    %92 = math.absf %91 : vector<8x128xf32>
    %cst_21 = arith.constant 3.750000e-01 : f32
    %93 = vector.broadcast %cst_21 : f32 to vector<8x128xf32>
    %94 = arith.mulf %93, %92 : vector<8x128xf32>
    %95 = arith.addf %86, %94 : vector<8x128xf32>
    %96 = vector.extract_strided_slice %31 {offsets = [0, 7], sizes = [8, 1], strides = [1, 1]} : vector<8x10xf32> to vector<8x1xf32>
    %97 = vector.extract_strided_slice %32 {offsets = [7, 0], sizes = [1, 128], strides = [1, 1]} : vector<10x128xf32> to vector<1x128xf32>
    %98 = vector.broadcast %96 : vector<8x1xf32> to vector<8x128xf32>
    %99 = vector.broadcast %97 : vector<1x128xf32> to vector<8x128xf32>
    %100 = arith.subf %98, %99 : vector<8x128xf32>
    %101 = math.absf %100 : vector<8x128xf32>
    %cst_22 = arith.constant 3.750000e-01 : f32
    %102 = vector.broadcast %cst_22 : f32 to vector<8x128xf32>
    %103 = arith.mulf %102, %101 : vector<8x128xf32>
    %104 = arith.addf %95, %103 : vector<8x128xf32>
    %105 = vector.extract_strided_slice %31 {offsets = [0, 8], sizes = [8, 1], strides = [1, 1]} : vector<8x10xf32> to vector<8x1xf32>
    %106 = vector.extract_strided_slice %32 {offsets = [8, 0], sizes = [1, 128], strides = [1, 1]} : vector<10x128xf32> to vector<1x128xf32>
    %107 = vector.broadcast %105 : vector<8x1xf32> to vector<8x128xf32>
    %108 = vector.broadcast %106 : vector<1x128xf32> to vector<8x128xf32>
    %109 = arith.subf %107, %108 : vector<8x128xf32>
    %110 = math.absf %109 : vector<8x128xf32>
    %cst_23 = arith.constant 3.750000e-01 : f32
    %111 = vector.broadcast %cst_23 : f32 to vector<8x128xf32>
    %112 = arith.mulf %111, %110 : vector<8x128xf32>
    %113 = arith.addf %104, %112 : vector<8x128xf32>
    %114 = vector.extract_strided_slice %31 {offsets = [0, 9], sizes = [8, 1], strides = [1, 1]} : vector<8x10xf32> to vector<8x1xf32>
    %115 = vector.extract_strided_slice %32 {offsets = [9, 0], sizes = [1, 128], strides = [1, 1]} : vector<10x128xf32> to vector<1x128xf32>
    %116 = vector.broadcast %114 : vector<8x1xf32> to vector<8x128xf32>
    %117 = vector.broadcast %115 : vector<1x128xf32> to vector<8x128xf32>
    %118 = arith.subf %116, %117 : vector<8x128xf32>
    %119 = math.absf %118 : vector<8x128xf32>
    %cst_24 = arith.constant 3.750000e-01 : f32
    %120 = vector.broadcast %cst_24 : f32 to vector<8x128xf32>
    %121 = arith.mulf %120, %119 : vector<8x128xf32>
    %122 = arith.addf %113, %121 : vector<8x128xf32>
    %c0_25 = arith.constant 0 : index
    %c0_26 = arith.constant 0 : index
    %c0_27 = arith.constant 0 : index
    %123 = vector.load %arg6[%c0_25, %c0_26, %c0_27] : memref<1x8x128xf32, #tpu.memory_space<vmem>>, vector<1x8x128xf32>
    %124 = vector.shape_cast %123 : vector<1x8x128xf32> to vector<8x128xf32>
    %125 = vector.shape_cast %122 : vector<8x128xf32> to vector<1x8x128xf32>
    tpu.vector_store %arg6[%c0_25, %c0_26, %c0_27], %125 {strides = array<i32>} : memref<1x8x128xf32, #tpu.memory_space<vmem>>, vector<1x8x128xf32>,
    return
  }
  func.func @transform_0(%arg0: i32, %arg1: i32, %arg2: i32) -> (i32, i32, i32) {
    %c0_i32 = arith.constant 0 : i32
    return %arg0, %arg1, %arg2 : i32, i32, i32
  }
  func.func @transform_1(%arg0: i32, %arg1: i32, %arg2: i32) -> (i32, i32, i32) {
    %c0_i32 = arith.constant 0 : i32
    %c0_i32_0 = arith.constant 0 : i32
    return %arg0, %arg1, %c0_i32 : i32, i32, i32
  }
  func.func @transform_2(%arg0: i32, %arg1: i32, %arg2: i32) -> (i32, i32) {
    %c0_i32 = arith.constant 0 : i32
    %c0_i32_0 = arith.constant 0 : i32
    return %c0_i32, %arg2 : i32, i32
  }
  func.func @transform_3(%arg0: i32, %arg1: i32, %arg2: i32) -> (i32, i32, i32) {
    %c0_i32 = arith.constant 0 : i32
    return %arg0, %arg1, %arg2 : i32, i32, i32
  }
}

</mosaic_0001>

<bundles_post_ra>
// kernel: tpu_custom_call.1
= control target key start
LH: loop header
LB: loop body
LE: loop exit
PB: predicated region body
PF: predicated region fallthrough
CT: control target
= control target key end

     0   :  { %s1053_s0 = inlined_call_operand.hbm [shape: f32[2,8,128], index: 0, kind: input, shape index: {}]   ;;  %s1054_s1 = inlined_call_operand.hbm [shape: f32[2,8,10], index: 1, kind: input, shape index: {}]   ;;  %s1055_s2 = inlined_call_operand.hbm [shape: f32[10,128], index: 2, kind: input, shape index: {}]   ;;  %s1056_s3 = inlined_call_operand.hbm [shape: f32[2,8,128], index: 3, kind: output, shape index: {}]  }
   0x1   :  { %1059 = sst [smem:[#allocation16_spill]] %s1055_s2 }
   0x2   :  { %8 = vsyncpa [#allocation3], 0 }
   0x3   :  { %10 = vsyncpa [#allocation3 + $0x1], 0 }
   0x4   :  { %11 = vsyncpa [#allocation6], 0 }
   0x5   :  { %13 = vsyncpa [#allocation6 + $0x1], 0 }
   0x6   :  { %14 = vsyncpa [#allocation4], 0 }
   0x7   :  { %16 = vsyncpa [#allocation4 + $0x1], 0  ;;  %s894_s12 = smov 0   ;;  %s896_s13 = smov 0  }
   0x8   :  { %s898_s14 = smov 0   ;;  %s900_s15 = smov 0  }
   0x9   :  { %s902_s16 = smov 0   ;;  %s904_s17 = smov 0  }
   0xa LB: > { %1060 = sst [smem:[#allocation13_spill]] %s855_s16  ;;  %s925_s18 = sadd.s32 4294967295, %s859_s17   ;;  %s859_s17 = sphi %s904_s17, %s22_s17   ;;  %s855_s16 = sphi %s902_s16, %s1071_s16   ;;  %s851_s15 = sphi %s900_s15, %s1070_s15   ;;  %s847_s14 = sphi %s898_s14, %s1074_s14   ;;  %s843_s13 = sphi %s896_s13, %s1073_s13   ;;  %s839_s12 = sphi %s894_s12, %s1072_s12  }
   0xb   : > { %p553_p0 = scmp.ge.s32.totalorder %s859_s17, 1  ;;  %p66_p1 = scmp.eq.s32.totalorder %s925_s18, 0 }
   0xc   : > { %p160_p2 = scmp.lt.s32.totalorder %s859_s17, 3  ;;  %s1061_s2 = sld [smem:[#allocation16_spill]] }
   0xd   : > { %s861_s23 = smov [#allocation7]   ;;  %p555_p6 = scmp.ge.s32.totalorder %s859_s17, 2 }
   0xe   : > { %p933_p3 = pnand %p553_p0, %p160_p2  ;;  %s175_s24 = sshll.u32 %s861_s23, 4  ;;  %s176_s24 = int_to_ptr.vmem [resolvable:$true] %s175_s24 }
   0xf   : > { %s862_s25 = smov 128   ;;  %s863_s26 = smov 8  }
  0x10   : > { %p580_p4 = pneg %p933_p3  ;;  %s552_s27 = sadd.s32 4294967294, %s859_s17  }
  0x11   : > { %s41_s28 = sadd.s32 1, %s855_s16  ;;  %s52_s29 = sadd.s32 1, %s847_s14 }
  0x12   : > { %s173_s21 = sshll.u32 %s1061_s2, 4  ;;  %p581_p5 = pnand %p580_p4, %p66_p1  ;;  %s174_s21 = int_to_ptr.hbm [resolvable:$true] %s173_s21 }
  0x13   : > { %p43_p7 = scmp.ge.s32.totalorder %s41_s28, 2  ;;  %p59_p8 = scmp.ne.s32.totalorder %s847_s14, %s843_s13 }
  0x14   : > { %583 = dma.hbm_to_vmem [thread:$0]  (!%p581_p5), %s174_s21, 256, %s176_s24, [#allocation6], %s862_s25, %s862_s25, %s863_s26  }
  0x15   : > { %p60_p9 = scmp.eq.s32.totalorder %s859_s17, 0  ;;  %p65_p10 = scmp.ne.s32.totalorder %s843_s13, %s839_s12 }
  0x16   : > { %s1076_s28 = smov (%p43_p7, %s41_s28), 0  ;;  %p147_p13 = scmp.eq.s32.totalorder %s925_s18, 1 }
  0x17   : > { %1063 = sst [smem:[#allocation14_spill]] %s1076_s28  ;;  %p952_p11 = por %p60_p9, %p59_p8 }
  0x18   : > { %p958_p12 = por %p66_p1, %p65_p10  ;;  %s45_s5 = ssub.s32 %s855_s16, %s1076_s28 }
  0x19   : > { %p50_p0 = scmp.eq.s32.totalorder %s45_s5, 0  ;;  %p153_p2 = scmp.eq.s32.totalorder %s552_s27, 1 }
  0x1a   : > { %p965_p4 = por %p147_p13, %p59_p8  ;;  %p596_p5 = scmp.lt.s32.totalorder %s859_s17, 2 }
  0x1b   : > { %s971_s7 = scalar_select %p50_p0, %s847_s14, %s52_s29  }
  0x1c   : > { %p973_p7 = por %p153_p2, %p65_p10  ;;  %s189_s9 = sand.u32 1, %s847_s14  }
  0x1d   : > { %1067 = sst [smem:[#allocation15_spill]] %s971_s7  ;;  %s556_s10 = sshll.u32 %s189_s9, 3 }
  0x1e   : > { %s557_s11 = sshll.u32 %s855_s16, 3  ;;  %s193_s23 = scalar_lea.vmem [#allocation2], %s556_s10 }
  0x1f   : > { %s199_s21 = scalar_lea.hbm %s1053_s0, %s557_s11  ;;  %s203_s24 = sshll.u32 %s193_s23, 4  ;;  %s204_s24 = int_to_ptr.vmem [resolvable:$true] %s203_s24 }
  0x20   : > { %s201_s25 = sshll.u32 %s199_s21, 4  ;;  %p585_p8 = pnand %p596_p5, %p952_p11  ;;  %s202_s25 = int_to_ptr.hbm [resolvable:$true] %s201_s25 }
  0x21   : > { %s219_s29 = scalar_lea.hbm %s1054_s1, %s557_s11  ;;  %s210_s5 = sand.u32 1, %s859_s17  }
  0x22   : > { %s190_s2 = scalar_lea.sflag [#allocation3], %s189_s9  ;;  %s221_s28 = sshll.u32 %s219_s29, 4  ;;  %s222_s28 = int_to_ptr.hbm [resolvable:$true] %s221_s28 }
  0x23   : > { %587 = dma.hbm_to_vmem [thread:$0]  (!%p585_p8), %s202_s25, 128, %s204_s24, %s190_s2  }
  0x24   : > { %s214_s16 = scalar_lea.vmem [#allocation5], %s556_s10  ;;  %s211_s19 = scalar_lea.sflag [#allocation6], %s210_s5 }
  0x25   : > { %s223_s7 = sshll.u32 %s214_s16, 4  ;;  %232 = sbr.rel (%p933_p3) target bundleno = 203 (0xcb), region = 32  ;;  %s224_s7 = int_to_ptr.vmem [resolvable:$true] %s223_s7 }
  0x26   : > { %590 = dma.hbm_to_vmem [thread:$0]  (!%p585_p8), %s222_s28, 128, %s224_s7, %s211_s19  }
  0x27   : > { %s991_s30 = sand.u32 (!%p933_p3), 1, %s843_s13  }
  0x28   : > { %s994_s11 = sshll.u32 (!%p933_p3), %s991_s30, 3  ;;  %s235_s2 = scalar_lea.sflag (!%p933_p3), [#allocation3], %s991_s30 }
  0x29   : > { %s238_s9 = scalar_lea.vmem (!%p933_p3), [#allocation2], %s994_s11 }
  0x2a   : > { %822 = dma.done.wait (%p958_p12), %s235_s2, 128  }
  0x2b   : > { %824 = vsyncadd (%p958_p12), %s235_s2, 4294967168  ;;  %s244_s16 = sand.u32 1, %s925_s18   ;;  %s248_s28 = scalar_lea.vmem [#allocation5], %s994_s11 }
  0x2c   : > { %s245_s22 = scalar_lea.sflag [#allocation6], %s244_s16 }
  0x2d   : > { %826 = dma.done.wait (%p958_p12), %s245_s22, 128  }
  0x2e   : > { %828 = vsyncadd (%p958_p12), %s245_s22, 4294967168 }
  0x2f   : > { %830 = dma.done.wait (%p66_p1), [#allocation6], 256  }
  0x30   : > { %832 = vsyncadd (%p66_p1), [#allocation6], 4294967040  ;;  %v864_v0 = vmov 2   ;;  %v865_v1 = vmov 0   ;;  %v866_v2 = vmov 4   ;;  %v318_v3 = vld [vmem:[%s248_s28] sm:$0xff] }
  0x31   : > { %662 = vset.pattern.permute.xlu1 %v864_v0  ;;  %660 = vset.pattern.permute.xlu0 %v865_v1  ;;  %v867_v4 = vmov 3   ;;  %v868_v5 = vmov 1   ;;  %v869_v6 = vmov 5   ;;  %v870_v7 = vmov 6   ;;  %v282_v11 = vld [vmem:[%s238_s9] sm:$0xff]  ;;  %s567_s18 = sshll.u32 %s851_s15, 3 }
  0x32   : > { %664 = vset.pattern.permute.xlu2 %v866_v2  ;;  %341 = vperm.xlu1 %662, %v318_v3   ;;  %v871_v8 = vmov 8   ;;  %v872_v9 = vmov 7   ;;  %v873_v10 = vmov 9   ;;  %v565_v12 = vmul.f32 -1.442695, %v282_v11  ;;  %v319_v31 = vld [vmem:[#allocation7] sm:$0xff]  ;;  %s426_s10 = scalar_lea.hbm %s1056_s3, %s567_s18 }
  0x33   : > { %323 = vperm.xlu0 %660, %v318_v3   ;;  %359 = vperm.xlu2 %664, %v318_v3   ;;  %v326_v36 = vperm.slane %v319_v31, 0  ;;  %v344_v45 = vperm.slane %v319_v31, 2  ;;  %v353_v49 = vperm.slane %v319_v31, 3  ;;  %v335_v50 = vperm.slane %v319_v31, 1  ;;  %v320_v1 = vld [vmem:[#allocation7 + $0x8] sm:$0x3] }
  0x34   : > { %671 = vpow2.f32 %v565_v12  ;;  %v362_v51 = vperm.slane %v319_v31, 4  ;;  %v371_v59 = vperm.slane %v319_v31, 5  ;;  %v389_v63 = vperm.slane %v319_v31, 7  ;;  %s281_s20 = scalar_lea.vmem [#allocation8], %s994_s11  ;;  %s430_s23 = sshll.u32 %s426_s10, 4  ;;  %s431_s23 = int_to_ptr.hbm [resolvable:$true] %s430_s23 }
  0x35   : > { %v398_v11 = vperm.slane %v320_v1, 0  ;;  %s428_s21 = sshll.u32 %s281_s20, 4  ;;  %s414_s15 = scalar_lea.sflag [#allocation4], %s991_s30  ;;  %s429_s21 = int_to_ptr.vmem [resolvable:$true] %s428_s21 }
  0x36   : > { %s783_s24 = sshra.s32 %s431_s23, 4  ;;  %s789_s29 = scalar_lea.hbm %s1056_s3, 16  ;;  %s784_s24 = int_to_ptr.hbm [resolvable:$true] %s783_s24 }
  0x37   : > { %s785_s25 = scalar_lea.hbm %s784_s24, 8  ;;  %p790_p10 = scmp.lt.s32.totalorder %s784_s24, %s1056_s3 }
  0x38   : > { %p786_p1 = scmp.ne.s32.totalorder %s784_s24, %s785_s25  ;;  %p791_p11 = scmp.lt.s32.totalorder %s789_s29, %s785_s25 }
  0x3a   : > { %663 = vset.pattern.permute.xlu1 %v867_v4  ;;  %v672_v13 = vpop.eup %671  ;;  %p787_p3 = pnand %p786_p1, %p965_p4  ;;  %p792_p12 = por %p791_p11, %p790_p10 }
  0x3b   : > { %661 = vset.pattern.permute.xlu0 %v868_v5  ;;  %350 = vperm.xlu1 %663, %v318_v3   ;;  %v286_v14 = vadd.f32 1.0, %v672_v13 }
  0x3c   : > { %332 = vperm.xlu0 %661, %v318_v3   ;;  %665 = vset.pattern.permute.xlu2 %v869_v6  ;;  %p788_p9 = pneg %p787_p3 }
  0x3d   : > { %368 = vperm.xlu2 %665, %v318_v3   ;;  %673 = vrcp.f32 %v286_v14  ;;  %vm292_vm0 = vweird.f32 %v286_v14  ;;  %v298_v19 = vand.u32 2147483648, %v286_v14  ;;  %v296_v21 = vand.u32 2147483647, %v286_v14 }
  0x3e   : > { %p793_p13 = pnand %p792_p12, %p788_p9 }
  0x3f   : > { %v299_v22 = vor.u32 1.1754944e-38, %v298_v19  ;;  %vm297_vm3 = vcmp.eq.f32.partialorder %v296_v21, 8.507059e+37 }
  0x43   : > { %666 = vset.pattern.permute.xlu1 %v870_v7  ;;  %v674_v15 = vpop.eup %673  ;;  %v380_v7 = vperm.slane %v319_v31, 6 }
  0x44   : > { %668 = vset.pattern.permute.xlu0 %v871_v8  ;;  %377 = vperm.xlu1 %666, %v318_v3   ;;  %v288_v16 = vmul.f32 %v674_v15, %v286_v14  ;;  %vm293_vm1 = vweird.f32 %v674_v15 }
  0x45   : > { %395 = vperm.xlu0 %668, %v318_v3   ;;  %667 = vset.pattern.permute.xlu2 %v872_v9  ;;  %vm294_vm2 = vmor %vm292_vm0, %vm293_vm1 }
  0x46   : > { %386 = vperm.xlu2 %667, %v318_v3   ;;  %v289_v17 = vsub.f32 1.0, %v288_v16 }
  0x48   : > { %v290_v18 = vmul.f32 %v674_v15, %v289_v17 }
  0x4a   : > { %v291_v20 = vadd.f32 %v674_v15, %v290_v18 }
  0x4c   : > { %669 = vset.pattern.permute.xlu1 %v873_v10  ;;  %v295_v23 = vsel %vm294_vm2, %v674_v15, %v291_v20 }
  0x4d   : > { %670 = vset.pattern.permute.xlu0 %v873_v10  ;;  %404 = vperm.xlu1 %669, %v318_v3   ;;  %v300_v24 = vsel %vm297_vm3, %v299_v22, %v295_v23 }
  0x4e   : > { %v302_v25 = vsub.f32 1.0, %v300_v24  ;;  %v312_v27 = vadd.f32 1e-08, %v300_v24  ;;  %v303_v32 = vmul.f32 %v300_v24, %v300_v24 }
  0x50   : > { %v306_v26 = vadd.f32 1e-08, %v302_v25  ;;  %v304_v33 = vmul.f32 %v302_v25, %v302_v25  ;;  %v305_v39 = vmul.f32 0.75, %v303_v32 }
  0x52   : > { %675 = vlog2.f32 %v306_v26  ;;  %v311_v41 = vmul.f32 0.25, %v304_v33 }
  0x53   : > { %677 = vlog2.f32 %v312_v27 }
  0x58   : > { %v676_v28 = vpop.eup %675 }
  0x59   : > { %v678_v30 = vpop.eup %677  ;;  %v308_v34 = vmul.f32 0.6931472, %v676_v28 }
  0x5a   : > { %v314_v35 = vmul.f32 0.6931472, %v678_v30 }
  0x5b   : > { %v309_v40 = vsub.f32 0.0, %v308_v34 }
  0x5c   : > { %v315_v42 = vsub.f32 0.0, %v314_v35 }
  0x5d   : > { %v310_v46 = vmul.f32 %v309_v40, %v305_v39 }
  0x5e   : > { %v316_v47 = vmul.f32 %v315_v42, %v311_v41 }
  0x60   : > { %v317_v53 = vsub.f32 %v316_v47, %v310_v46 }
  0x8d   : > { %v360_v29 = vpop.permute.xlu2 %359 }
  0x8e   : > { %v363_v60 = vsub.f32 %v360_v29, %v362_v51  ;;  %v407_v29 = vperm.slane %v320_v1, 1 }
  0x90   : > { %v364_v6 = vand.u32 2147483647, %v363_v60 }
  0x92   : > { %v365_v18 = vmul.f32 0.375, %v364_v6 }
  0x97   : > { %v369_v44 = vpop.permute.xlu2 %368 }
  0x98   : > { %v372_v5 = vsub.f32 %v369_v44, %v371_v59 }
  0x9a   : > { %v373_v14 = vand.u32 2147483647, %v372_v5 }
  0x9c   : > { %v374_v24 = vmul.f32 0.375, %v373_v14 }
  0xa0   : > { %v387_v0 = vpop.permute.xlu2 %386 }
  0xa1   : > { %v390_v10 = vsub.f32 %v387_v0, %v389_v63 }
  0xa3   : > { %v391_v20 = vand.u32 2147483647, %v390_v10 }
  0xa4   : > { %v342_v37 = vpop.permute.xlu1 %341 }
  0xa5   : > { %v324_v38 = vpop.permute.xlu0 %323  ;;  %v345_v52 = vsub.f32 %v342_v37, %v344_v45  ;;  %v392_v27 = vmul.f32 0.375, %v391_v20 }
  0xa6   : > { %v327_v43 = vsub.f32 %v324_v38, %v326_v36 }
  0xa7   : > { %v346_v61 = vand.u32 2147483647, %v345_v52 }
  0xa8   : > { %v328_v48 = vand.u32 2147483647, %v327_v43 }
  0xa9   : > { %v347_v8 = vmul.f32 0.375, %v346_v61 }
  0xaa   : > { %v329_v56 = vmul.f32 3.0, %v328_v48 }
  0xac   : > { %v330_v2 = vadd.f32 %v329_v56, %v317_v53 }
  0xad   : > { %v351_v54 = vpop.permute.xlu1 %350 }
  0xae   : > { %v333_v55 = vpop.permute.xlu0 %332  ;;  %v354_v57 = vsub.f32 %v351_v54, %v353_v49 }
  0xaf   : > { %v336_v58 = vsub.f32 %v333_v55, %v335_v50 }
  0xb0   : > { %v355_v3 = vand.u32 2147483647, %v354_v57 }
  0xb1   : > { %v337_v62 = vand.u32 2147483647, %v336_v58 }
  0xb2   : > { %v356_v12 = vmul.f32 0.375, %v355_v3 }
  0xb3   : > { %v338_v4 = vmul.f32 3.0, %v337_v62 }
  0xb5   : > { %v339_v9 = vadd.f32 %v338_v4, %v330_v2 }
  0xb6   : > { %v378_v15 = vpop.permute.xlu1 %377 }
  0xb7   : > { %v348_v13 = vadd.f32 %v347_v8, %v339_v9  ;;  %v396_v16 = vpop.permute.xlu0 %395  ;;  %v381_v17 = vsub.f32 %v378_v15, %v380_v7 }
  0xb8   : > { %v399_v21 = vsub.f32 %v396_v16, %v398_v11 }
  0xb9   : > { %v357_v19 = vadd.f32 %v356_v12, %v348_v13  ;;  %v382_v22 = vand.u32 2147483647, %v381_v17 }
  0xba   : > { %v400_v28 = vand.u32 2147483647, %v399_v21 }
  0xbb   : > { %v366_v23 = vadd.f32 %v365_v18, %v357_v19  ;;  %v383_v25 = vmul.f32 0.375, %v382_v22 }
  0xbc   : > { %v401_v33 = vmul.f32 0.375, %v400_v28 }
  0xbd   : > { %v375_v26 = vadd.f32 %v374_v24, %v366_v23 }
  0xbf   : > { %v384_v30 = vadd.f32 %v383_v25, %v375_v26  ;;  %v405_v31 = vpop.permute.xlu1 %404 }
  0xc0   : > { %v408_v34 = vsub.f32 %v405_v31, %v407_v29 }
  0xc1   : > { %v393_v32 = vadd.f32 %v392_v27, %v384_v30 }
  0xc2   : > { %v409_v35 = vand.u32 2147483647, %v408_v34 }
  0xc3   : > { %v402_v36 = vadd.f32 %v401_v33, %v393_v32 }
  0xc4   : > { %v410_v37 = vmul.f32 0.375, %v409_v35 }
  0xc6   : > { %v411_v38 = vadd.f32 %v410_v37, %v402_v36 }
  0xc8   : > { %412 = vst [vmem:[%s281_s20] sm:$0xff] %v411_v38 }
  0xc9   : > { %796 = shalt.err (!%p793_p13)
}
  0xca   : > { %578 = dma.vmem_to_hbm [thread:$0]  (%p965_p4), %s429_s21, 128, %s431_s23, %s414_s15  }
  0xcb PF: > { %s442_s30 = sand.u32 1, %s839_s12   ;;  %p592_p0 = pnand %p555_p6, %p973_p7 }
  0xcc   : > { %s443_s11 = scalar_lea.sflag [#allocation4], %s442_s30 }
  0xcd   : > { %p593_p2 = pneg %p592_p0 }
  0xcf   : > { %834 = dma.done.wait (%p593_p2), %s443_s11, 128  }
  0xd0   : > { %836 = vsyncadd (%p593_p2), %s443_s11, 4294967168  ;;  %s22_s17 = sadd.s32 1, %s859_s17   ;;  %s1069_s2 = sld [smem:[#allocation15_spill]] }
  0xd1   : > { %p19_p5 = scmp.ge.s32.totalorder %s22_s17, 4   ;;  %s1070_s15 = sld [smem:[#allocation13_spill]] }
  0xd2   : > { %s1071_s16 = sld [smem:[#allocation14_spill]]  ;;  %s1072_s12 = smov %s843_s13 }
  0xd3   : > { %s1073_s13 = smov %s847_s14  ;;  %21 = sbr.rel (!%p19_p5) target bundleno = 10 (0xa), region = 95 }
  0xd6   : > { %s1074_s14 = smov %s1069_s2 }
  0xd8   :  { %449 = vsyncpa [#allocation3], 1 }
  0xd9   :  { %451 = vsyncpa [#allocation3 + $0x1], 1 }
  0xda   :  { %452 = vsyncpa [#allocation6], 1 }
  0xdb   :  { %454 = vsyncpa [#allocation6 + $0x1], 1 }
  0xdc   :  { %455 = vsyncpa [#allocation4], 1 }
  0xdd   :  { %457 = vsyncpa [#allocation4 + $0x1], 1 }

</bundles_post_ra>
